<compile_context>
chip_gen: v7x
topology: tpu7x:2x2x1
jax: 0.10.0
libtpu: 0.0.40
codegen_flags: <defaults>
</compile_context>

<pallas_src>
import functools

import jax
import jax.numpy as jnp
from jax import lax
from jax.experimental import pallas as pl
from jax.experimental.pallas import tpu as pltpu


# ----------------------------------------------------------------------------
# Per-generation tuning defaults.
# ----------------------------------------------------------------------------
def _tpu_defaults():
    """(num_cores, weight_block_bytes, vmem_limit_bytes) per TPU generation."""
    kind = ""
    try:
        kind = jax.devices()[0].device_kind.lower()
    except Exception:
        pass
    if "v7" in kind:
        # 2 TensorCores / 64 MiB VMEM: shard modules across cores, small blocks.
        return 2, 3 * 2**20, 48 * 2**20
    if "v6" in kind:
        # 1 TensorCore / 128 MiB VMEM / ~1.4 TB/s HBM: big streamed blocks.
        return 1, 8 * 2**20, 100 * 2**20
    if "v5" in kind or "v4" in kind:
        return 1, 8 * 2**20, 80 * 2**20
    # Unknown chip: conservative (the values the previous version ran with).
    return 1, 2 * 2**20, 32 * 2**20


# ----------------------------------------------------------------------------
# IterativeAttention kernel: G modules per grid step, 2-D grid (core, step).
# ----------------------------------------------------------------------------
def _iter_attn_kernel(x_ref, xsel_ref, wdiag_ref, w_ref, out_ref, *,
                      r, steps_per_core):
    c = pl.program_id(0)            # core (parallel) axis
    s = pl.program_id(1)            # module-block (reduction) axis

    @pl.when(s == 0)
    def _():
        out_ref[...] = jnp.zeros_like(out_ref)

    G, D_out, D_in = w_ref.shape
    B = x_ref.shape[0]
    base = (c * steps_per_core + s) * G          # first module of this block

    x_bf = x_ref[...]                            # (B, D_in)        bf16
    w_bf = w_ref[...]                            # (G, D_out, D_in) bf16
    w_flat = w_bf.reshape(G * D_out, D_in)       # leading-dim merge (free)

    # All logits of the block in ONE MXU call:
    #   logits_t[g*D_out + o, b] = sum_d W[g, o, d] * x[b, d]
    logits_t = lax.dot_general(w_flat, x_bf, (((1,), (1,)), ((), ())),
                               preferred_element_type=jnp.float32)
    logits = logits_t.reshape(G, D_out, B)       # split of leading dim only

    # Rank-1 correction emulates zeroing column (base+g) of x for module g:
    #   logits[g, :, b] -= W[g, :, base+g] * x[b, base+g]
    # (side inputs hold exactly the bf16 values the MXU saw, so the masked
    #  column cancels to accumulation-order precision.)
    logits = logits - wdiag_ref[0] * xsel_ref[0]     # (G,D_out,1) * (G,1,B)

    # Softmax over D_out (axis 1); reciprocal on the EUP.
    m = jnp.max(logits, axis=1, keepdims=True)
    e = jnp.exp(logits - m)
    attn = e * pl.reciprocal(jnp.sum(e, axis=1, keepdims=True), approx=True)

    # Zero the contribution of padded (out-of-range) modules.
    valid = (lax.broadcasted_iota(jnp.int32, (G, 1, B), 0) + base) < D_in
    attn = jnp.where(valid, attn, 0.0)

    # Batch mean commutes with the second matmul: sum attention over batch now
    # and fold the sum over the block's G modules into the contraction
    # (K = G*D_out) of a single bf16 MXU call.
    a_col = jnp.sum(attn.reshape(G * D_out, B), axis=1, keepdims=True)
    a_col = a_col.astype(jnp.bfloat16)                        # (G*D_out, 1)
    expw = jnp.exp(w_flat.astype(jnp.float32) * jnp.float32(r))
    expw = expw.astype(jnp.bfloat16)                          # (G*D_out, D_in)
    z = lax.dot_general(a_col, expw, (((0,), (0,)), ((), ())),
                        preferred_element_type=jnp.float32)   # (1, D_in)

    # Accumulate raw sums; /(B*D_in) and the final softmax run once in the
    # wrapper.
    out_ref[...] += z[None]


def iterative_attention(x, weights, r=1.0, *, num_cores=None,
                        max_block_bytes=None, vmem_limit_bytes=None):
    """x: (B, D_in) f32; weights: (D_in, D_out, D_in) f32 -> softmax'd (D_in,)."""
    B, D_in = x.shape
    n_mod, D_out, d2 = weights.shape
    assert n_mod == D_in and d2 == D_in

    nc_d, mb_d, vl_d = _tpu_defaults()
    num_cores = nc_d if num_cores is None else num_cores
    max_block_bytes = mb_d if max_block_bytes is None else max_block_bytes
    vmem_limit_bytes = vl_d if vmem_limit_bytes is None else vmem_limit_bytes

    # Modules per grid step: largest count whose bf16 weight block fits the
    # budget.  Pad the module count up to num_cores*steps*g so awkward D_in
    # never collapses the block size (padded modules have zero weights and are
    # masked in-kernel).
    bytes_per_module = D_out * D_in * 2
    per_core = -(-D_in // num_cores)
    g = max(1, min(per_core, max_block_bytes // max(bytes_per_module, 1)))
    steps = -(-per_core // g)
    n_blocks = num_cores * steps
    n_pad = n_blocks * g

    # bf16-rounded copies so the in-kernel rank-1 correction cancels the masked
    # column of the MXU matmul exactly (kernel is weight-HBM-traffic bound;
    # bf16 streaming halves that traffic).
    w_bf = weights.astype(jnp.bfloat16)                  # (D_in, D_out, D_in)
    x_bf = x.astype(jnp.bfloat16)                        # (B, D_in)
    w_diag = jnp.diagonal(w_bf, axis1=0, axis2=2).T      # (D_in, D_out) = W[i,:,i]

    pad = n_pad - D_in
    w_pad = jnp.pad(w_bf, ((0, pad), (0, 0), (0, 0))) if pad else w_bf
    wd_pad = jnp.pad(w_diag, ((0, pad), (0, 0))) if pad else w_diag
    x_cols = jnp.pad(x_bf, ((0, 0), (0, pad))) if pad else x_bf

    # Tiny per-block side inputs for the rank-1 correction.
    wd_arr = wd_pad.reshape(n_blocks, g, D_out, 1).astype(jnp.float32)
    xs_arr = x_cols.T.reshape(n_blocks, g, 1, B).astype(jnp.float32)

    flops = int(2 * n_pad * D_out * D_in * (B + 1))
    transcendentals = int(n_pad * D_out * (D_in + B))
    bytes_accessed = int(2 * n_pad * D_out * D_in + 2 * B * D_in
                         + wd_arr.size * 4 + xs_arr.size * 4
                         + 4 * num_cores * D_in)

    kernel = functools.partial(_iter_attn_kernel, r=float(r),
                               steps_per_core=steps)

    out = pl.pallas_call(
        kernel,
        out_shape=jax.ShapeDtypeStruct((num_cores, 1, D_in), jnp.float32),
        grid_spec=pltpu.PrefetchScalarGridSpec(
            num_scalar_prefetch=0,
            grid=(num_cores, steps),
            in_specs=[
                pl.BlockSpec((B, D_in), lambda c, s: (0, 0)),
                pl.BlockSpec((1, g, 1, B),
                             lambda c, s: (c * steps + s, 0, 0, 0)),
                pl.BlockSpec((1, g, D_out, 1),
                             lambda c, s: (c * steps + s, 0, 0, 0)),
                pl.BlockSpec((g, D_out, D_in),
                             lambda c, s: (c * steps + s, 0, 0)),
            ],
            out_specs=pl.BlockSpec((1, 1, D_in), lambda c, s: (c, 0, 0)),
        ),
        compiler_params=pltpu.CompilerParams(
            dimension_semantics=("parallel", "arbitrary"),
            vmem_limit_bytes=vmem_limit_bytes),
        cost_estimate=pl.CostEstimate(flops=flops,
                                      transcendentals=transcendentals,
                                      bytes_accessed=bytes_accessed),
    )(x_bf, xs_arr, wd_arr, w_pad)

    # Finalize: combine per-core partials, mean over modules and batch, softmax.
    com_sum = jnp.sum(out[:, 0, :], axis=0)              # (D_in,)
    com_mean = com_sum / jnp.float32(B * D_in)
    return jax.nn.softmax(com_mean, axis=0)


# ----------------------------------------------------------------------------
# BatchNorm1d (train-mode batch stats) and the MLP head as simple Pallas kernels.
# ----------------------------------------------------------------------------
def _bn_kernel(x_ref, gamma_ref, beta_ref, o_ref, *, eps):
    x = x_ref[...]
    mean = jnp.mean(x, axis=0, keepdims=True)
    var = jnp.mean(jnp.square(x - mean), axis=0, keepdims=True)
    o_ref[...] = (x - mean) * lax.rsqrt(var + jnp.float32(eps)) * gamma_ref[...] \
        + beta_ref[...]


def _head_kernel(x_ref, attn_ref, w1_ref, b1_ref, w2_ref, b2_ref, o_ref):
    xs = x_ref[...] * attn_ref[...]                                  # (B, D_in)
    h = lax.dot_general(xs, w1_ref[...], (((1,), (1,)), ((), ())),
                        preferred_element_type=jnp.float32) + b1_ref[...]
    h = jnp.maximum(h, 0.0)
    o_ref[...] = lax.dot_general(h, w2_ref[...], (((1,), (1,)), ((), ())),
                                 preferred_element_type=jnp.float32) + b2_ref[...]


def ifem_forward(x, params, r=1.0):
    """Full IFEM forward: bn -> iterative attention -> x*attn -> fc1 -> relu -> fc2."""
    gamma, beta, attn_w, w1, b1, w2, b2 = params
    B, D_in = x.shape
    O = w2.shape[0]

    # TODO(synk): the BN / head kernels take whole arrays in VMEM (fine at these
    # sizes); block them for very large batches.
    xb = pl.pallas_call(
        functools.partial(_bn_kernel, eps=1e-5),
        out_shape=jax.ShapeDtypeStruct((B, D_in), jnp.float32),
    )(x.astype(jnp.float32), gamma[None, :], beta[None, :])

    attn = iterative_attention(xb, attn_w, r=r)

    out = pl.pallas_call(
        _head_kernel,
        out_shape=jax.ShapeDtypeStruct((B, O), jnp.float32),
    )(xb, attn[None, :], w1, b1[None, :], w2, b2[None, :])

    return out, attn, xb


# ----------------------------------------------------------------------------
# Pure-JAX reference mirroring the PyTorch module.
# ----------------------------------------------------------------------------
def _reference_ifem(x, attn_weights, gamma, beta, w1, b1, w2, b2, r=1.0, eps=1e-5):
    mean = jnp.mean(x, axis=0, keepdims=True)
    var = jnp.mean(jnp.square(x - mean), axis=0, keepdims=True)
    xb = (x - mean) * lax.rsqrt(var + eps) * gamma + beta

    D_in = xb.shape[1]
    results = []
    for i in range(D_in):
        mask = jnp.ones((D_in,), jnp.float32).at[i].set(0.0)
        xm = xb * mask
        w = attn_weights[i]
        a = jax.nn.softmax(xm @ w.T, axis=1)
        z = a @ jnp.exp(w * r)
        results.append(jnp.mean(z, axis=0))
    com_mean = jnp.mean(jnp.stack(results, axis=1), axis=1)
    attn = jax.nn.softmax(com_mean, axis=0)

    h = jnp.maximum((xb * attn) @ w1.T + b1, 0.0)
    out = h @ w2.T + b2
    return out, attn, xb


if __name__ == "__main__":
    key = jax.random.PRNGKey(0)
    ks = jax.random.split(key, 6)

    B, D_in, D_out, H = 8, 8, 16, 32   # batch, input_size, output_size, hidden
    r = 1.0

    x = jax.random.normal(ks[0], (B, D_in), dtype=jnp.float32)
    # Stacked weights of the D_in Attention modules (each Linear(D_in, D_out, bias=False)).
    attn_w = 0.1 * jax.random.normal(ks[1], (D_in, D_out, D_in), dtype=jnp.float32)
    gamma = jnp.ones((D_in,), jnp.float32)
    beta = jnp.zeros((D_in,), jnp.float32)
    w1 = 0.2 * jax.random.normal(ks[2], (H, D_in), dtype=jnp.float32)
    b1 = 0.05 * jax.random.normal(ks[3], (H,), dtype=jnp.float32)
    w2 = 0.2 * jax.random.normal(ks[4], (D_out, H), dtype=jnp.float32)
    b2 = 0.05 * jax.random.normal(ks[5], (D_out,), dtype=jnp.float32)

    out, attn, xb = ifem_forward(x, (gamma, beta, attn_w, w1, b1, w2, b2), r=r)
    out = jax.block_until_ready(out)

    # Reference uses the same bf16-rounded attention weights (deliberate
    # streaming precision), everything else in f32.
    attn_w_bf = attn_w.astype(jnp.bfloat16).astype(jnp.float32)
    ref_out, ref_attn, ref_xb = _reference_ifem(
        x, attn_w_bf, gamma, beta, w1, b1, w2, b2, r=r)

    assert out.shape == (B, D_out)
    assert attn.shape == (D_in,)
    assert jnp.allclose(xb, ref_xb, atol=1e-4, rtol=1e-4), "batchnorm mismatch"
    assert jnp.allclose(attn, ref_attn, atol=5e-3, rtol=5e-2), (attn, ref_attn)
    assert jnp.allclose(out, ref_out, atol=2e-2, rtol=5e-2), (out, ref_out)

    # Also exercise the padded / multi-step / multi-block path: force g=3 so the
    # grid is (2, 2) with 4 zero-weight padded modules masked in-kernel.
    attn_ragged = jax.block_until_ready(
        iterative_attention(xb, attn_w, r=r, num_cores=2,
                            max_block_bytes=3 * D_out * D_in * 2))
    assert jnp.allclose(attn_ragged, ref_attn, atol=5e-3, rtol=5e-2), (
        attn_ragged, ref_attn)

    print("KERNEL_OK")
</pallas_src>

<mosaic_0001>
module attributes {stable_mosaic.version = 11 : i64} {
  func.func @_bn_kernel(%arg0: memref<8x8xf32, #tpu.memory_space<vmem>>, %arg1: memref<1x8xf32, #tpu.memory_space<vmem>>, %arg2: memref<1x8xf32, #tpu.memory_space<vmem>>, %arg3: memref<8x8xf32, #tpu.memory_space<vmem>>) attributes {dimension_semantics = [], scalar_prefetch = 0 : i64, scratch_operands = 0 : i64, tpu.core_type = #tpu.core_type<tc>} {
    %c0 = arith.constant 0 : index
    %c0_0 = arith.constant 0 : index
    %0 = vector.load %arg0[%c0, %c0_0] : memref<8x8xf32, #tpu.memory_space<vmem>>, vector<8x8xf32>
    %cst = arith.constant dense<0.000000e+00> : vector<8xf32>
    %1 = vector.multi_reduction <add>, %0, %cst [0] : vector<8x8xf32> to vector<8xf32>
    %2 = vector.shape_cast %1 : vector<8xf32> to vector<1x8xf32>
    %cst_1 = arith.constant 8.000000e+00 : f32
    %3 = vector.broadcast %cst_1 : f32 to vector<1x8xf32>
    %4 = arith.divf %2, %3 : vector<1x8xf32>
    %5 = vector.broadcast %4 : vector<1x8xf32> to vector<8x8xf32>
    %6 = arith.subf %0, %5 : vector<8x8xf32>
    %7 = arith.mulf %6, %6 : vector<8x8xf32>
    %cst_2 = arith.constant dense<0.000000e+00> : vector<8xf32>
    %8 = vector.multi_reduction <add>, %7, %cst_2 [0] : vector<8x8xf32> to vector<8xf32>
    %9 = vector.shape_cast %8 : vector<8xf32> to vector<1x8xf32>
    %cst_3 = arith.constant 8.000000e+00 : f32
    %10 = vector.broadcast %cst_3 : f32 to vector<1x8xf32>
    %11 = arith.divf %9, %10 : vector<1x8xf32>
    %12 = vector.broadcast %4 : vector<1x8xf32> to vector<8x8xf32>
    %13 = arith.subf %0, %12 : vector<8x8xf32>
    %cst_4 = arith.constant 9.99999974E-6 : f32
    %14 = vector.broadcast %cst_4 : f32 to vector<1x8xf32>
    %15 = arith.addf %11, %14 : vector<1x8xf32>
    %16 = math.rsqrt %15 : vector<1x8xf32>
    %17 = vector.broadcast %16 : vector<1x8xf32> to vector<8x8xf32>
    %18 = arith.mulf %13, %17 : vector<8x8xf32>
    %c0_5 = arith.constant 0 : index
    %c0_6 = arith.constant 0 : index
    %19 = vector.load %arg1[%c0_5, %c0_6] : memref<1x8xf32, #tpu.memory_space<vmem>>, vector<1x8xf32>
    %20 = vector.broadcast %19 : vector<1x8xf32> to vector<8x8xf32>
    %21 = arith.mulf %18, %20 : vector<8x8xf32>
    %c0_7 = arith.constant 0 : index
    %c0_8 = arith.constant 0 : index
    %22 = vector.load %arg2[%c0_7, %c0_8] : memref<1x8xf32, #tpu.memory_space<vmem>>, vector<1x8xf32>
    %23 = vector.broadcast %22 : vector<1x8xf32> to vector<8x8xf32>
    %24 = arith.addf %21, %23 : vector<8x8xf32>
    %c0_9 = arith.constant 0 : index
    %c0_10 = arith.constant 0 : index
    %25 = vector.load %arg3[%c0_9, %c0_10] : memref<8x8xf32, #tpu.memory_space<vmem>>, vector<8x8xf32>
    tpu.vector_store %arg3[%c0_9, %c0_10], %24 {strides = array<i32>} : memref<8x8xf32, #tpu.memory_space<vmem>>, vector<8x8xf32>,
    return
  }
}

</mosaic_0001>

<bundles_post_ra>
// kernel: tpu_custom_call.1
= control target key start
LH: loop header
LB: loop body
LE: loop exit
PB: predicated region body
PF: predicated region fallthrough
CT: control target
= control target key end

     0   :  { %8 = vsyncpa [#allocation3], 0  ;;  %s192_s0 = inlined_call_operand.hbm [shape: f32[8,8], index: 0, kind: input, shape index: {}]   ;;  %s193_s1 = inlined_call_operand.vmem [shape: f32[1,8], index: 1, kind: input, shape index: {}]   ;;  %s194_s2 = inlined_call_operand.vmem [shape: f32[1,8], index: 2, kind: input, shape index: {}]   ;;  %s195_s3 = inlined_call_operand.hbm [shape: f32[8,8], index: 3, kind: output, shape index: {}]  }
   0x1   :  { %9 = vsyncpa [#allocation4], 0  ;;  %s137_s12 = smov [#allocation2]   ;;  %s89_s16 = scalar_lea.hbm %s192_s0, 128 }
   0x2   :  { %s16_s13 = sshll.u32 %s137_s12, 4  ;;  %p90_p0 = scmp.ne.s32.totalorder %s192_s0, %s89_s16  ;;  %s17_s13 = int_to_ptr.vmem [resolvable:$true] %s16_s13 }
   0x3   :  { %p93_p1 = scmp.lt.u32.totalorder %s89_s16, %s192_s0 }
   0x5   :  { %p95_p2 = pnand %p93_p1, %p90_p0 }
   0x7   :  { %98 = shalt.err (!%p95_p2)
}
   0x8   :  { %s99_s21 = scalar_lea.vmem %s17_s13, 128  ;;  %p104_p4 = scmp.lt.s32.totalorder %s17_s13, %s17_s13 }
   0x9   :  { %p100_p3 = scmp.ne.s32.totalorder %s17_s13, %s99_s21  ;;  %p105_p5 = scmp.lt.s32.totalorder %s99_s21, %s99_s21 }
   0xb   :  { %p106_p6 = por %p105_p5, %p104_p4 }
   0xd   :  { %p107_p7 = pnand %p106_p6, %p100_p3 }
   0xf   :  { %110 = shalt.err (!%p107_p7)
}
  0x10   :  { %19 = dma.hbm_to_vmem [thread:$0]  %s192_s0, 128, %s17_s13, [#allocation3]  }
  0x11   :  { %133 = dma.done.wait [#allocation3], 128  }
  0x12   :  { %134 = vsyncadd [#allocation3], 4294967168  ;;  %vm28_vm0 = vcmask 64512   ;;  %v27_v0 = vld [vmem:[#allocation2] sm:$0xff]  ;;  %s138_s27 = smov [#allocation5]  }
  0x13   :  { %v29_v1 = vsel %vm28_vm0, %v27_v0, 0.0  ;;  %v83_v21 = vld [vmem:[%s193_s1] ss:$0 sm:$0xff]  ;;  %s74_s28 = sshll.u32 %s138_s27, 4  ;;  %s75_s28 = int_to_ptr.vmem [resolvable:$true] %s74_s28 }
  0x14   :  { %v30_v2 = vrot.slane %v29_v1, 4  ;;  %v84_v23 = vld [vmem:[%s194_s2] ss:$0 sm:$0xff]  ;;  %s111_s29 = scalar_lea.vmem %s75_s28, 128  ;;  %p116_p9 = scmp.lt.s32.totalorder %s75_s28, %s75_s28 }
  0x15   :  { %p112_p8 = scmp.ne.s32.totalorder %s75_s28, %s111_s29  ;;  %p117_p10 = scmp.lt.s32.totalorder %s111_s29, %s111_s29 }
  0x16   :  { %v31_v3 = vadd.f32 %v30_v2, %v29_v1 }
  0x17   :  { %p118_p11 = por %p117_p10, %p116_p9 }
  0x18   :  { %v32_v4 = vrot.slane %v31_v3, 2 }
  0x19   :  { %p119_p12 = pnand %p118_p11, %p112_p8 }
  0x1a   :  { %v33_v5 = vadd.f32 %v32_v4, %v31_v3 }
  0x1c   :  { %v34_v6 = vrot.slane %v33_v5, 1 }
  0x1e   :  { %v35_v7 = vadd.f32 %v34_v6, %v33_v5 }
  0x20   :  { %v37_v8 = vmul.f32 0.125, %v35_v7 }
  0x22   :  { %v38_v9 = vsub.f32 %v27_v0, %v37_v8 }
  0x24   :  { %v39_v10 = vmul.f32 %v38_v9, %v38_v9 }
  0x26   :  { %v40_v11 = vsel %vm28_vm0, %v39_v10, 0.0 }
  0x27   :  { %v41_v12 = vrot.slane %v40_v11, 4 }
  0x29   :  { %v42_v13 = vadd.f32 %v41_v12, %v40_v11 }
  0x2b   :  { %v43_v14 = vrot.slane %v42_v13, 2 }
  0x2d   :  { %v44_v15 = vadd.f32 %v43_v14, %v42_v13 }
  0x2f   :  { %v45_v16 = vrot.slane %v44_v15, 1 }
  0x31   :  { %v46_v17 = vadd.f32 %v45_v16, %v44_v15 }
  0x33   :  { %v47_v18 = vmul.f32 0.125, %v46_v17 }
  0x35   :  { %v48_v19 = vadd.f32 1e-05, %v47_v18 }
  0x37   :  { %87 = vrsqrt.f32 %v48_v19 }
  0x41   :  { %v88_v20 = vpop.eup %87 }
  0x42   :  { %v50_v22 = vmul.f32 %v88_v20, %v38_v9 }
  0x44   :  { %v58_v24 = vmul.f32 %v83_v21, %v50_v22 }
  0x46   :  { %v66_v25 = vadd.f32 %v84_v23, %v58_v24 }
  0x48   :  { %67 = vst.msk [vmem:[#allocation5] sm:$0xff] %vm28_vm0, %v66_v25 }
  0x49   :  { %122 = shalt.err (!%p119_p12)
}
  0x4a   :  { %s123_s4 = scalar_lea.hbm %s195_s3, 128 }
  0x4b   :  { %p124_p13 = scmp.ne.s32.totalorder %s195_s3, %s123_s4  ;;  %p127_p0 = scmp.lt.u32.totalorder %s123_s4, %s195_s3 }
  0x4d   :  { %p129_p1 = pnand %p127_p0, %p124_p13 }
  0x4f   :  { %132 = shalt.err (!%p129_p1)
}
  0x50   :  { %77 = dma.vmem_to_hbm [thread:$0]  %s75_s28, 128, %s195_s3, [#allocation4]  }
  0x51   :  { %135 = dma.done.wait [#allocation4], 128  }
  0x52   :  { %136 = vsyncadd [#allocation4], 4294967168 }
  0x53   :  { %81 = vsyncpa [#allocation3], 1 }
  0x54   :  { %82 = vsyncpa [#allocation4], 1 }

</bundles_post_ra>
